<compile_context>
chip_gen: v6e
topology: v6e:2x2x1
jax: 0.10.0
libtpu: 0.0.40
codegen_flags: <defaults>
</compile_context>

<pallas_src>
import jax
import jax.numpy as jnp
from jax.experimental import pallas as pl
from jax.experimental.pallas import tpu as pltpu


def _round_up(x, m):
    return (x + m - 1) // m * m


def _split_bf16(t, n_split):
    """Split an f32 table into n_split bf16 planes whose sum reconstructs it.

    n_split=2 (hi/lo) reconstructs to ~2^-17 relative accuracy; n_split=3 is ~f32 exact.
    Exact for the 0/1 one-hot contraction since each plane is selected exactly.
    """
    parts = []
    resid = t.astype(jnp.float32)
    for _ in range(n_split - 1):
        p = resid.astype(jnp.bfloat16)
        parts.append(p)
        resid = resid - p.astype(jnp.float32)
    parts.append(resid.astype(jnp.bfloat16))
    return parts


def kd_embedding_kernel(idx_ref, tbl_ref, out_ref):
    # idx_ref: (T, J) int32 — per-token row indices into the packed table
    #          (already offset by plane*max_len in the wrapper).
    # tbl_ref: (Lp, D) bf16 — all tables / hi-lo planes packed along rows,
    #          whole-array VMEM resident (single copy, loaded once).
    # out_ref: (T, D) out_dtype.
    T, D = out_ref.shape
    Lp = tbl_ref.shape[0]
    J = idx_ref.shape[1]

    idx = idx_ref[...]                                           # (T, J)
    col = jax.lax.broadcasted_iota(jnp.int32, (T, Lp), 1)        # (T, Lp)

    # One-hot with J ones per row (one per table plane); targets are distinct columns.
    # J is small (k * n_split), so the unrolled OR keeps only ~2 live bool tiles.
    hit = col == idx[:, 0:1]
    for j in range(1, J):
        hit = hit | (col == idx[:, j:j + 1])
    onehot = hit.astype(jnp.bfloat16)                            # 0/1 exact in bf16

    # Single MXU contraction; f32 accumulation sums the k tables (and hi/lo planes).
    acc = jnp.dot(onehot, tbl_ref[...], preferred_element_type=jnp.float32)
    out_ref[...] = acc.astype(out_ref.dtype)


def kd_embedding(tables, positions, *, block_tokens=512, f32_split=2, interpret=False):
    """tables: list of k (max_len, D) arrays; positions: list of k (B, S) int arrays."""
    k = len(tables)
    assert len(positions) == k and k >= 1
    B, S = positions[0].shape
    max_len, D = tables[0].shape
    N = B * S
    out_dtype = tables[0].dtype

    # ---- Pack all tables (splitting f32 into bf16 hi/lo planes) into one bf16 table.
    planes = []  # list of (source_table_index, (max_len, D) bf16 plane)
    for i, t in enumerate(tables):
        assert t.shape == (max_len, D)
        if t.dtype == jnp.bfloat16:
            parts = [t]
        else:
            parts = _split_bf16(t, f32_split)
        for p in parts:
            planes.append((i, p))
    J = len(planes)                      # total planes = contraction "hits" per token
    L = J * max_len
    Lp = _round_up(L, 128)               # lane/sublane-friendly contraction depth
    packed = jnp.concatenate([p for _, p in planes], axis=0)
    if Lp != L:
        packed = jnp.pad(packed, ((0, Lp - L), (0, 0)))          # never selected

    # ---- Per-token row indices into the packed table (offset per plane).
    pos_flat = [p.reshape(N).astype(jnp.int32) for p in positions]
    idx = jnp.stack(
        [pos_flat[i] + j * max_len for j, (i, _) in enumerate(planes)], axis=1
    )                                                            # (N, J) int32

    # ---- Token tile size T: multiple of 8, large (amortize per-step overhead), but
    #      (a) in-kernel one-hot + f32 acc stay modest, (b) >= 2 grid steps for v7x's 2 TCs.
    N8 = _round_up(N, 8)
    T = min(max(8, block_tokens - block_tokens % 8), N8)
    while T > 8 and T * (2 * Lp + 4 * D + 4 * J) > (8 << 20):
        T = max(8, (T // 2) // 8 * 8)
    if N8 > 8 and pl.cdiv(N, T) < 2:
        T = max(8, _round_up(N8 // 2, 8))
    grid = (pl.cdiv(N, T),)

    # ---- Generation-aware VMEM limit (resident table counted ONCE — no double-buffer).
    out_itemsize = jnp.dtype(out_dtype).itemsize
    table_bytes = Lp * D * 2                                     # single resident copy
    pipeline_bytes = 2 * (T * J * 4) + 2 * (T * D * out_itemsize)  # double-buffered tiles
    work_bytes = T * Lp * 2 + T * D * 4                          # one-hot + f32 acc bound
    needed = table_bytes + pipeline_bytes + work_bytes + (4 << 20)
    try:
        vmem_cap = int(pltpu.get_tpu_info().vmem_capacity_bytes)
    except Exception:
        vmem_cap = 64 << 20                                      # conservative (v7x-sized)
    vmem_limit = int(max(32 << 20, min(needed, vmem_cap - (12 << 20))))

    out = pl.pallas_call(
        kd_embedding_kernel,
        grid=grid,
        in_specs=[
            pl.BlockSpec((T, J), lambda n: (n, 0)),              # per-step index tile
            pl.BlockSpec(memory_space=pltpu.MemorySpace.VMEM),   # whole table, resident
        ],
        out_specs=pl.BlockSpec((T, D), lambda n: (n, 0)),        # lane-dense output tile
        out_shape=jax.ShapeDtypeStruct((N, D), out_dtype),
        compiler_params=pltpu.CompilerParams(
            dimension_semantics=("parallel",),
            vmem_limit_bytes=vmem_limit,
        ),
        interpret=interpret,
    )(idx, packed)

    return out.reshape(B, S, D)                                  # free reshape, no slice


if __name__ == "__main__":
    # Module hyper-params (small, consistent with the forward semantics).
    dim_model = 128
    k = 2
    max_len = 64
    B, S = 2, 8

    key = jax.random.PRNGKey(0)
    tkeys = jax.random.split(key, 2 * k)

    # nn.Embedding default init is N(0, 1).
    tables = [
        jax.random.normal(tkeys[i], (max_len, dim_model), dtype=jnp.float32)
        for i in range(k)
    ]
    positions = [
        jax.random.randint(tkeys[k + i], (B, S), 0, max_len, dtype=jnp.int32)
        for i in range(k)
    ]

    out = kd_embedding(tables, positions)
    out = jax.block_until_ready(out)

    # Pure-JAX reference: rst = sum_i tables[i][positions[i]]
    ref = sum(tables[i][positions[i]] for i in range(k))
    assert out.shape == (B, S, dim_model)
    # hi/lo bf16 split reconstructs f32 table entries to ~2^-17 relative accuracy,
    # so per-element error is well below 1e-4 for N(0,1) tables.
    assert jnp.allclose(out, ref, atol=1e-4, rtol=1e-4), "mismatch vs reference"

    print("KERNEL_OK")
</pallas_src>

<mosaic_0001>
module attributes {stable_mosaic.version = 11 : i64} {
  func.func @kd_embedding_kernel(%arg0: i32, %arg1: memref<8x4xi32, #tpu.memory_space<vmem>>, %arg2: memref<256x128xbf16, #tpu.memory_space<vmem>>, %arg3: memref<8x128xf32, #tpu.memory_space<vmem>>) attributes {dimension_semantics = [#tpu.dimension_semantics<parallel>], iteration_bounds = array<i64: 2>, scalar_prefetch = 0 : i64, scratch_operands = 0 : i64, tpu.core_type = #tpu.core_type<tc>, window_params = [{transform_indices = @transform_0, window_bounds = array<i64: 8, 4>}, {pipeline_mode = #tpu.pipeline_mode<synchronous>, transform_indices = @transform_1, window_bounds = array<i64: 256, 128>}, {transform_indices = @transform_2, window_bounds = array<i64: 8, 128>}]} {
    %c0 = arith.constant 0 : index
    %c0_0 = arith.constant 0 : index
    %0 = vector.load %arg1[%c0, %c0_0] : memref<8x4xi32, #tpu.memory_space<vmem>>, vector<8x4xi32>
    %1 = tpu.iota {dimensions = array<i32: 1>} : vector<8x256xi32>
    %2 = vector.extract_strided_slice %0 {offsets = [0, 0], sizes = [8, 1], strides = [1, 1]} : vector<8x4xi32> to vector<8x1xi32>
    %3 = vector.broadcast %2 : vector<8x1xi32> to vector<8x256xi32>
    %4 = arith.cmpi eq, %1, %3 : vector<8x256xi32>
    %5 = vector.extract_strided_slice %0 {offsets = [0, 1], sizes = [8, 1], strides = [1, 1]} : vector<8x4xi32> to vector<8x1xi32>
    %6 = vector.broadcast %5 : vector<8x1xi32> to vector<8x256xi32>
    %7 = arith.cmpi eq, %1, %6 : vector<8x256xi32>
    %8 = arith.ori %4, %7 : vector<8x256xi1>
    %9 = vector.extract_strided_slice %0 {offsets = [0, 2], sizes = [8, 1], strides = [1, 1]} : vector<8x4xi32> to vector<8x1xi32>
    %10 = vector.broadcast %9 : vector<8x1xi32> to vector<8x256xi32>
    %11 = arith.cmpi eq, %1, %10 : vector<8x256xi32>
    %12 = arith.ori %8, %11 : vector<8x256xi1>
    %13 = vector.extract_strided_slice %0 {offsets = [0, 3], sizes = [8, 1], strides = [1, 1]} : vector<8x4xi32> to vector<8x1xi32>
    %14 = vector.broadcast %13 : vector<8x1xi32> to vector<8x256xi32>
    %15 = arith.cmpi eq, %1, %14 : vector<8x256xi32>
    %16 = arith.ori %12, %15 : vector<8x256xi1>
    %17 = arith.extui %16 : vector<8x256xi1> to vector<8x256xi32>
    %18 = arith.sitofp %17 : vector<8x256xi32> to vector<8x256xf32>
    %19 = arith.truncf %18 : vector<8x256xf32> to vector<8x256xbf16>
    %c0_1 = arith.constant 0 : index
    %c0_2 = arith.constant 0 : index
    %20 = vector.load %arg2[%c0_1, %c0_2] : memref<256x128xbf16, #tpu.memory_space<vmem>>, vector<256x128xbf16>
    %cst = arith.constant dense<0.000000e+00> : vector<8x128xf32>
    %21 = tpu.matmul %19, %20, %cst {dimension_numbers = #tpu.dot_dimension_numbers<[1], [0], [0], [1], [0, 0, 1, 1], [], []>} : vector<8x256xbf16>, vector<256x128xbf16>, vector<8x128xf32> -> vector<8x128xf32>
    %c0_3 = arith.constant 0 : index
    %c0_4 = arith.constant 0 : index
    %22 = vector.load %arg3[%c0_3, %c0_4] : memref<8x128xf32, #tpu.memory_space<vmem>>, vector<8x128xf32>
    tpu.vector_store %arg3[%c0_3, %c0_4], %21 {strides = array<i32>} : memref<8x128xf32, #tpu.memory_space<vmem>>, vector<8x128xf32>,
    return
  }
  func.func @transform_0(%arg0: i32) -> (i32, i32) {
    %c0_i32 = arith.constant 0 : i32
    %c0_i32_0 = arith.constant 0 : i32
    return %arg0, %c0_i32 : i32, i32
  }
  func.func @transform_1(%arg0: i32) -> (i32, i32) {
    %c0_i32 = arith.constant 0 : i32
    %c0_i32_0 = arith.constant 0 : i32
    %c0_i32_1 = arith.constant 0 : i32
    return %c0_i32, %c0_i32_0 : i32, i32
  }
  func.func @transform_2(%arg0: i32) -> (i32, i32) {
    %c0_i32 = arith.constant 0 : i32
    %c0_i32_0 = arith.constant 0 : i32
    return %arg0, %c0_i32 : i32, i32
  }
}

</mosaic_0001>

<bundles_post_ra>
// kernel: tpu_custom_call.1
= control target key start
LH: loop header
LB: loop body
LE: loop exit
PB: predicated region body
PF: predicated region fallthrough
CT: control target
= control target key end

     0   :  { %7 = vsyncpa [#allocation3], 0  ;;  %s812_s0 = inlined_call_operand.vmem [shape: s32[16,4], index: 0, kind: input, shape index: {}]   ;;  %s813_s1 = inlined_call_operand.hbm [shape: bf16[256,128], index: 1, kind: input, shape index: {}]   ;;  %s814_s2 = inlined_call_operand.hbm [shape: f32[16,128], index: 2, kind: output, shape index: {}]  }
   0x1   :  { %8 = vsyncpa [#allocation4], 0 }
   0x2   :  { %10 = vsyncpa [#allocation4 + $0x1], 0  ;;  %s695_s9 = smov 0   ;;  %s697_s10 = smov 0  }
   0x3   :  { %s699_s11 = smov 0   ;;  %s701_s12 = smov 0  }
   0x4 LB: > { %s716_s13 = sadd.s32 4294967295, %s669_s12   ;;  %s445_s14 = sadd.s32 4294967294, %s669_s12   ;;  %s669_s12 = sphi %s701_s12, %s822_s12   ;;  %s665_s11 = sphi %s699_s11, %s821_s11   ;;  %s661_s10 = sphi %s697_s10, %s820_s10   ;;  %s657_s9 = sphi %s695_s9, %s819_s9  }
   0x5   : > { %s720_s15 = sadd.s32 1, %s669_s12   ;;  %s70_s16 = sadd.s32 1, %s665_s11 }
   0x6   : > { %s67_s17 = ssub.s32 %s669_s12, %s720_s15  ;;  %p80_p0 = scmp.ne.s32.totalorder %s665_s11, %s661_s10 }
   0x7   : > { %p68_p1 = scmp.eq.s32.totalorder %s67_s17, 0  ;;  %p81_p2 = scmp.eq.s32.totalorder %s716_s13, 1 }
   0x8   : > { %p86_p3 = scmp.ne.s32.totalorder %s661_s10, %s657_s9  ;;  %p87_p4 = scmp.eq.s32.totalorder %s445_s14, 1 }
   0x9   : > { %s731_s18 = scalar_select %p68_p1, %s665_s11, %s70_s16  }
   0xa   : > { %p733_p5 = por %p81_p2, %p80_p0  ;;  %p737_p6 = por %p87_p4, %p86_p3 }
   0xb   : > { %p446_p7 = scmp.ge.s32.totalorder %s669_s12, 1  ;;  %p94_p8 = scmp.lt.s32.totalorder %s669_s12, 3 }
   0xc   : > { %s816_s20 = scalar_select %p737_p6, 1, 0 }
   0xd   : > { %p515_p9 = scmp.eq.s32.totalorder %s716_s13, 0  ;;  %p744_p10 = pnand %p446_p7, %p94_p8 }
   0xe   : > { %s671_s22 = smov [#allocation2]  }
   0xf   : > { %s106_s23 = sshll.u32 %s671_s22, 4  ;;  %p507_p11 = pneg %p744_p10  ;;  %s107_s23 = int_to_ptr.vmem [resolvable:$true] %s106_s23 }
  0x10   : > { %s590_s24 = scalar_lea.vmem %s107_s23, 2048  ;;  %p598_p3 = scmp.lt.s32.totalorder %s107_s23, %s107_s23 }
  0x11   : > { %p508_p12 = pnand %p515_p9, %p507_p11  ;;  %p591_p0 = scmp.ne.s32.totalorder %s107_s23, %s590_s24 }
  0x12   : > { %p599_p4 = scmp.lt.s32.totalorder %s590_s24, %s590_s24 }
  0x13   : > { %p581_p13 = pneg %p508_p12 }
  0x14   : > { %p600_p6 = por %p599_p4, %p598_p3 }
  0x15   : > { %p593_p1 = pnand %p591_p0, %p581_p13 }
  0x17   : > { %p594_p2 = pneg %p593_p1 }
  0x19   : > { %p601_p7 = pnand %p600_p6, %p594_p2 }
  0x1b   : > { %604 = shalt.err (!%p601_p7)
}
  0x1c   : > { %s672_s25 = smov 64   ;;  %s673_s26 = smov 4  }
  0x1d   : > { %510 = dma.hbm_to_vmem [thread:$0]  (!%p508_p12), %s813_s1, 2048, %s107_s23, [#allocation3], %s672_s25, %s672_s25, %s673_s26  }
  0x1e   : > { %129 = sbr.rel (%p744_p10) target bundleno = 393 (0x189), region = 28 }
  0x23   : > { %648 = dma.done.wait (%p515_p9), [#allocation3], 2048  }
  0x24   : > { %650 = vsyncadd (%p515_p9), [#allocation3], 4294965248  ;;  %p150_p8 = scmp.lt.s32.totalorder %s716_s13, 1  ;;  %v674_v0 = vmov 0   ;;  %v675_v1 = vmov 2   ;;  %v563_v3 = vld [vmem:[#allocation2 + $0x78] sm:$0xff]   ;;  %v156_v21 = vlaneseq }
  0x25   : > { %558 = vset.pattern.permute.xlu0 %v674_v0  ;;  %560 = vset.pattern.permute.xlu1 %v675_v1  ;;  %v564_v4 = vld [vmem:[#allocation2 + $0x38] sm:$0xff]   ;;  %v565_v5 = vld [vmem:[#allocation2 + $0x70] sm:$0xff]   ;;  %v676_v7 = vmov 1   ;;  %v677_v8 = vmov 3   ;;  %v567_v9 = vld [vmem:[#allocation2 + $0x68] sm:$0xff]   ;;  %s147_s6 = sand.u32 1, %s661_s10  }
  0x26   : > { %s151_s29 = scalar_select %p150_p8, %s716_s13, 1  ;;  %479 = vmatprep.subr.bf16.mxu0 %v563_v3  ;;  %v566_v6 = vld [vmem:[#allocation2 + $0x30] sm:$0xff]   ;;  %v568_v10 = vld [vmem:[#allocation2 + $0x28] sm:$0xff]   ;;  %v569_v11 = vld [vmem:[#allocation2 + $0x60] sm:$0xff]   ;;  %v157_v22 = vand.u32 127, %v156_v21 }
  0x27   : > { %480 = vmatpush3.bf16.msra.mxu0 %v564_v4  ;;  %v570_v12 = vld [vmem:[#allocation2 + $0x20] sm:$0xff]   ;;  %v571_v13 = vld [vmem:[#allocation2 + $0x58] sm:$0xff]   ;;  %v573_v15 = vld [vmem:[#allocation2 + $0x50] sm:$0xff]   ;;  %v678_v28 = vmov 1.0|1.0   ;;  %s451_s7 = sshll.u32 %s147_s6, 3 }
  0x28   : > { %s452_s30 = sshll.u32 %s151_s29, 3  ;;  %481 = vmatprep.subr.bf16.mxu0 %v565_v5  ;;  %v572_v14 = vld [vmem:[#allocation2 + $0x18] sm:$0xff]   ;;  %v574_v16 = vld [vmem:[#allocation2 + $0x10] sm:$0xff]   ;;  %v575_v17 = vld [vmem:[#allocation2 + $0x48] sm:$0xff]   ;;  %v158_v25 = vadd.s32 128, %v157_v22  ;;  %s476_s8 = sshll.u32 %s716_s13, 7 }
  0x29   : > { %s153_s5 = scalar_lea.vmem %s812_s0, %s452_s30  ;;  %v576_v18 = vld [vmem:[#allocation2 + $0x8] sm:$0xff]   ;;  %v577_v19 = vld [vmem:[#allocation2 + $0x40] sm:$0xff]   ;;  %s149_s14 = scalar_lea.vmem [#allocation5], %s451_s7 }
  0x2a   : > { %v155_v2 = vld [vmem:[%s153_s5] sm:$0xff]  ;;  %s374_s16 = sshll.u32 %s149_s14, 4  ;;  %s771_s22 = scalar_lea.hbm %s814_s2, %s476_s8  ;;  %s773_s16 = int_to_ptr.vmem [resolvable:$true] %s374_s16 }
  0x2b   : > { %160 = vperm.xlu0 %558, %v155_v2   ;;  %172 = vperm.xlu1 %560, %v155_v2   ;;  %v578_v20 = vld [vmem:[#allocation2] sm:$0xff]   ;;  %s361_s23 = scalar_lea.sflag [#allocation4], %s147_s6  ;;  %s605_s24 = scalar_lea.vmem %s773_s16, 128 }
  0x2c   : > { %482 = vmatpush3.bf16.msra.mxu0 %v566_v6  ;;  %p606_p6 = scmp.ne.s32.totalorder %s773_s16, %s605_s24  ;;  %s679_s13 = smov [#allocation5]  }
  0x2d   : > { %483 = vmatprep.subr.bf16.mxu0 %v567_v9  ;;  %s609_s25 = sshll.u32 %s679_s13, 4  ;;  %s610_s25 = int_to_ptr.vmem [resolvable:$false] %s609_s25 }
  0x2e   : > { %p607_p9 = pnand %p606_p6, %p733_p5  ;;  %s611_s26 = scalar_lea.vmem %s610_s25, 256 }
  0x2f   : > { %559 = vset.pattern.permute.xlu0 %v676_v7  ;;  %561 = vset.pattern.permute.xlu1 %v677_v8  ;;  %p612_p11 = scmp.lt.s32.totalorder %s773_s16, %s610_s25  ;;  %p613_p12 = scmp.lt.s32.totalorder %s611_s26, %s605_s24 }
  0x30   : > { %165 = vperm.xlu0 %559, %v155_v2   ;;  %179 = vperm.xlu1 %561, %v155_v2   ;;  %p608_p10 = pneg %p607_p9 }
  0x31   : > { %484 = vmatpush3.bf16.msra.mxu0 %v568_v10  ;;  %p614_p13 = por %p613_p12, %p612_p11 }
  0x32   : > { %485 = vmatprep.subr.bf16.mxu0 %v569_v11 }
  0x33   : > { %p615_p0 = pnand %p614_p13, %p608_p10 }
  0x34   : > { %562 = vset.pattern.permute.xlu0 %v677_v8 }
  0x35   : > { %486 = vmatpush3.bf16.msra.mxu0 %v570_v12 }
  0x36   : > { %487 = vmatprep.subr.bf16.mxu0 %v571_v13 }
  0x39   : > { %488 = vmatpush3.bf16.msra.mxu0 %v572_v14 }
  0x3a   : > { %489 = vmatprep.subr.bf16.mxu0 %v573_v15 }
  0x3d   : > { %490 = vmatpush3.bf16.msra.mxu0 %v574_v16 }
  0x3e   : > { %491 = vmatprep.subr.bf16.mxu0 %v575_v17 }
  0x41   : > { %492 = vmatpush3.bf16.msra.mxu0 %v576_v18 }
  0x42   : > { %493 = vmatprep.subr.bf16.mxu0 %v577_v19 }
  0x45   : > { %494 = vmatpush3.bf16.msra.mxu0 %v578_v20 }
  0xa6   : > { %v161_v23 = vpop.permute.xlu0 %160  ;;  %v173_v24 = vpop.permute.xlu1 %172 }
  0xa7   : > { %vm162_vm0 = vcmp.eq.s32.totalorder %v157_v22, %v161_v23  ;;  %vm163_vm3 = vcmp.eq.s32.totalorder %v158_v25, %v161_v23  ;;  %vm174_vm6 = vcmp.eq.s32.totalorder %v157_v22, %v173_v24  ;;  %vm175_vm11 = vcmp.eq.s32.totalorder %v158_v25, %v173_v24 }
  0xab   : > { %v166_v26 = vpop.permute.xlu0 %165  ;;  %v180_v27 = vpop.permute.xlu1 %179 }
  0xac   : > { %vm167_vm1 = vcmp.eq.s32.totalorder %v157_v22, %v166_v26  ;;  %vm168_vm2 = vcmp.eq.s32.totalorder %v158_v25, %v166_v26  ;;  %vm181_vm5 = vcmp.eq.s32.totalorder %v157_v22, %v180_v27  ;;  %vm182_vm9 = vcmp.eq.s32.totalorder %v158_v25, %v180_v27 }
  0xad   : > { %vm169_vm4 = vmor %vm162_vm0, %vm167_vm1 }
  0xae   : > { %vm170_vm7 = vmor %vm163_vm3, %vm168_vm2 }
  0xaf   : > { %vm176_vm8 = vmor %vm169_vm4, %vm174_vm6 }
  0xb0   : > { %vm183_vm10 = vmor %vm176_vm8, %vm181_vm5 }
  0xb1   : > { %vm473_vm12 = vmpackc.low %vm183_vm10, %vm183_vm10 }
  0xb2   : > { %vm177_vm13 = vmor %vm170_vm7, %vm175_vm11 }
  0xb3   : > { %vm184_vm14 = vmor %vm177_vm13, %vm182_vm9 }
  0xb4   : > { %vm471_vm15 = vmpackc.low %vm184_vm14, %vm184_vm14 }
  0xb5   : > { %472 = vmatprep.mubr.msk.bf16.mxu0 %vm471_vm15, %v678_v28 }
  0xb6   : > { %474 = vmatmul.mubr.msk.bf16.vlgmr.msra.gmra.mxu0 %vm473_vm12, %v678_v28 }
 0x176   : > { %v495_v29 = vpop.f32.mrf.mxu0 }
 0x178   : > { %v496_v30 = vpop.f32.mrf.mxu0 }
 0x179   : > { %v497_v31 = vadd.f32 %v496_v30, %v495_v29 }
 0x17a   : > { %v498_v32 = vpop.f32.mrf.mxu0 }
 0x17b   : > { %359 = vst [vmem:[%s149_s14] sm:$0xff] %v497_v31 }
 0x17c   : > { %v499_v33 = vpop.f32.mrf.mxu0 }
 0x17d   : > { %618 = shalt.err (!%p615_p0)
}
 0x17e   : > { %s619_s27 = scalar_lea.hbm %s771_s22, 128  ;;  %s623_s30 = scalar_lea.hbm %s814_s2, 256 }
 0x17f   : > { %p620_p1 = scmp.ne.s32.totalorder %s771_s22, %s619_s27  ;;  %p624_p4 = scmp.lt.s32.totalorder %s771_s22, %s814_s2 }
 0x180   : > { %p625_p7 = scmp.lt.s32.totalorder %s623_s30, %s619_s27 }
 0x181   : > { %p621_p2 = pnand %p620_p1, %p733_p5 }
 0x182   : > { %p626_p8 = por %p625_p7, %p624_p4 }
 0x183   : > { %p622_p3 = pneg %p621_p2 }
 0x185   : > { %p627_p6 = pnand %p626_p8, %p622_p3 }
 0x187   : > { %630 = shalt.err (!%p627_p6)
}
 0x188   : > { %505 = dma.vmem_to_hbm [thread:$0]  (%p733_p5), %s773_s16, 128, %s771_s22, %s361_s23  }
 0x189 PF: > { %p517_p9 = scmp.ge.s32.totalorder %s669_s12, 2  ;;  %s386_s5 = sand.u32 1, %s657_s9  }
 0x18a   : > { %p818_p10 = scmp.ne.s32.totalorder %s816_s20, 0  ;;  %s387_s6 = scalar_lea.sflag [#allocation4], %s386_s5 }
 0x18c   : > { %p512_p11 = pnand %p517_p9, %p818_p10 }
 0x18e   : > { %p513_p12 = pneg %p512_p11 }
 0x190   : > { %652 = dma.done.wait (%p513_p12), %s387_s6, 128  }
 0x191   : > { %654 = vsyncadd (%p513_p12), %s387_s6, 4294967168  ;;  %p13_p13 = scmp.ge.s32.totalorder %s720_s15, 4   ;;  %s819_s9 = smov %s661_s10 }
 0x192   : > { %s820_s10 = smov %s665_s11  ;;  %s821_s11 = smov %s731_s18 }
 0x193   : > { %s822_s12 = smov %s720_s15  ;;  %15 = sbr.rel (!%p13_p13) target bundleno = 4 (0x4), region = 68 }
 0x198   :  { %392 = vsyncpa [#allocation3], 1 }
 0x199   :  { %394 = vsyncpa [#allocation3 + $0x1], 1 }
 0x19a   :  { %395 = vsyncpa [#allocation4], 1 }
 0x19b   :  { %397 = vsyncpa [#allocation4 + $0x1], 1 }

</bundles_post_ra>
